<compile_context>
chip_gen: v6e
topology: v6e:2x2x1
jax: 0.10.0
libtpu: 0.0.40
codegen_flags: <defaults>
</compile_context>

<pallas_src>
import functools

import jax
import jax.numpy as jnp
from jax.experimental import pallas as pl
from jax.experimental.pallas import tpu as pltpu

_LANE = 128
_SUB = 8
_TM_MAX = 2048   # rows per block -> 1 MiB f32 per input block


def _wbce_kernel(x_ref, t_ref, out_ref, *, pos_weight, tm):
    x = x_ref[...].astype(jnp.float32)
    t = t_ref[...].astype(jnp.float32)

    # PyTorch formulation:
    #   max_val = max(-x, 0)
    #   loss = x - x*t + (max_val + log(exp(-max_val) + exp(-x - max_val)))
    #                    * (1 + (pos_weight - 1) * t)
    # and max_val + log(...) == max(-x, 0) + log1p(exp(-|x|))  (stable form).
    max_val = jnp.maximum(-x, 0.0)
    log_term = max_val + jnp.log1p(jnp.exp(-jnp.abs(x)))
    weight = 1.0 + (pos_weight - 1.0) * t
    loss = x - x * t + log_term * weight

    # Fold the (tm, 128) block into this step's own (8, 128) partial block with
    # pure VPU adds (no cross-lane reduction, no carried accumulator).
    out_ref[...] = loss.reshape(tm // _SUB, _SUB, _LANE).sum(axis=0)


def _native_float(a):
    # Stream floating dtypes untouched; promote bool/int labels to f32 once.
    if jnp.issubdtype(a.dtype, jnp.floating):
        return a
    return a.astype(jnp.float32)


def _in_spec(tm, chunks):
    index_map = lambda i: (i, 0)
    # 3-deep input buffering (v7x: hides DMA jitter at 3.2 TB/s); only when the
    # grid is long enough to benefit, with a fallback for older jax versions.
    if chunks >= 4 and hasattr(pl, "Buffered"):
        try:
            return pl.BlockSpec((tm, _LANE), index_map,
                                pipeline_mode=pl.Buffered(3))
        except TypeError:
            pass
    return pl.BlockSpec((tm, _LANE), index_map)


def weighted_bce_with_logits_loss(inputs, targets, pos_weight=1.0):
    """Pallas implementation of WeightedBCEWithLogitsLoss.forward (mean loss)."""
    pos_weight = float(pos_weight)
    x = _native_float(inputs.reshape(-1))
    t = _native_float(targets.reshape(-1))
    n = x.shape[0]

    # Largest (tm*128)-aligned prefix goes through the kernel; tm multiple of 8.
    rows_full = n // _LANE
    tm = min(_TM_MAX, (rows_full // _SUB) * _SUB)

    total = jnp.zeros((), jnp.float32)

    if tm >= _SUB:
        chunks = rows_full // tm
        n_kernel = chunks * tm * _LANE

        x2 = x[:n_kernel].reshape(chunks * tm, _LANE)   # no-copy bitcast
        t2 = t[:n_kernel].reshape(chunks * tm, _LANE)

        partials = pl.pallas_call(
            functools.partial(_wbce_kernel, pos_weight=pos_weight, tm=tm),
            out_shape=jax.ShapeDtypeStruct((chunks, _SUB, _LANE), jnp.float32),
            grid_spec=pltpu.PrefetchScalarGridSpec(
                num_scalar_prefetch=0,
                grid=(chunks,),
                in_specs=[_in_spec(tm, chunks), _in_spec(tm, chunks)],
                out_specs=pl.BlockSpec((None, _SUB, _LANE),
                                       lambda i: (i, 0, 0)),
            ),
            compiler_params=pltpu.CompilerParams(
                dimension_semantics=("parallel",),
                vmem_limit_bytes=32 * 1024 * 1024,
            ),
        )(x2, t2)
        total = total + jnp.sum(partials)
    else:
        n_kernel = 0

    if n_kernel < n:
        # Tiny ragged tail (< tm*128 + 127 elements) in plain JAX.
        xt = x[n_kernel:].astype(jnp.float32)
        tt = t[n_kernel:].astype(jnp.float32)
        max_val = jnp.maximum(-xt, 0.0)
        log_term = max_val + jnp.log1p(jnp.exp(-jnp.abs(xt)))
        tail = xt - xt * tt + log_term * (1.0 + (pos_weight - 1.0) * tt)
        total = total + jnp.sum(tail)

    return total / jnp.float32(n)


def _reference(inputs, targets, pos_weight=1.0):
    x = inputs.reshape(-1).astype(jnp.float32)
    t = targets.reshape(-1).astype(jnp.float32)
    max_val = jnp.maximum(-x, 0.0)
    loss = x - x * t + (
        max_val + jnp.log(jnp.exp(-max_val) + jnp.exp(-x - max_val))
    ) * (1.0 + (pos_weight - 1.0) * t)
    return jnp.mean(loss)


if __name__ == "__main__":
    key = jax.random.PRNGKey(0)
    k1, k2, k3, k4 = jax.random.split(key, 4)

    # Case 1: NCHW-like shapes (batch=2, channels=4, spatial=16x16); even size,
    # kernel covers everything.
    logits = jax.random.normal(k1, (2, 4, 16, 16), dtype=jnp.float32)
    targets = (jax.random.uniform(k2, (2, 4, 16, 16)) > 0.5).astype(jnp.float32)

    out = jax.block_until_ready(
        weighted_bce_with_logits_loss(logits, targets, 2.0))
    ref = _reference(logits, targets, 2.0)
    assert jnp.allclose(out, ref, rtol=1e-5, atol=1e-5), (out, ref)

    # Case 2: ragged size -> aligned prefix through the kernel + JAX tail.
    logits2 = jax.random.normal(k3, (3, 5, 7, 11), dtype=jnp.float32)
    targets2 = (jax.random.uniform(k4, (3, 5, 7, 11)) > 0.5).astype(jnp.float32)

    out2 = jax.block_until_ready(
        weighted_bce_with_logits_loss(logits2, targets2, 3.0))
    ref2 = _reference(logits2, targets2, 3.0)
    assert jnp.allclose(out2, ref2, rtol=1e-5, atol=1e-5), (out2, ref2)

    # Case 3: bf16 inputs streamed natively (cast to f32 inside the kernel).
    logits3 = logits.astype(jnp.bfloat16)
    targets3 = targets.astype(jnp.bfloat16)

    out3 = jax.block_until_ready(
        weighted_bce_with_logits_loss(logits3, targets3, 2.0))
    ref3 = _reference(logits3, targets3, 2.0)
    assert jnp.allclose(out3, ref3, rtol=1e-5, atol=1e-5), (out3, ref3)

    print("KERNEL_OK")
</pallas_src>

<mosaic_0001>
module attributes {stable_mosaic.version = 11 : i64} {
  func.func @_wbce_kernel(%arg0: i32, %arg1: memref<16x128xf32, #tpu.memory_space<vmem>>, %arg2: memref<16x128xf32, #tpu.memory_space<vmem>>, %arg3: memref<1x8x128xf32, #tpu.memory_space<vmem>>) attributes {dimension_semantics = [#tpu.dimension_semantics<parallel>], iteration_bounds = array<i64: 1>, scalar_prefetch = 0 : i64, scratch_operands = 0 : i64, tpu.core_type = #tpu.core_type<tc>, window_params = [{transform_indices = @transform_0, window_bounds = array<i64: 16, 128>}, {transform_indices = @transform_1, window_bounds = array<i64: 16, 128>}, {transform_indices = @transform_2, window_bounds = array<i64: 1, 8, 128>}]} {
    %c0 = arith.constant 0 : index
    %c0_0 = arith.constant 0 : index
    %0 = vector.load %arg1[%c0, %c0_0] : memref<16x128xf32, #tpu.memory_space<vmem>>, vector<16x128xf32>
    %c0_1 = arith.constant 0 : index
    %c0_2 = arith.constant 0 : index
    %1 = vector.load %arg2[%c0_1, %c0_2] : memref<16x128xf32, #tpu.memory_space<vmem>>, vector<16x128xf32>
    %cst = arith.constant 0.000000e+00 : f32
    %2 = vector.broadcast %cst : f32 to vector<16x128xf32>
    %3 = arith.subf %2, %0 : vector<16x128xf32>
    %cst_3 = arith.constant 0.000000e+00 : f32
    %4 = vector.broadcast %cst_3 : f32 to vector<16x128xf32>
    %5 = arith.maximumf %3, %4 : vector<16x128xf32>
    %6 = math.absf %0 : vector<16x128xf32>
    %cst_4 = arith.constant 0.000000e+00 : f32
    %7 = vector.broadcast %cst_4 : f32 to vector<16x128xf32>
    %8 = arith.subf %7, %6 : vector<16x128xf32>
    %9 = math.exp %8 : vector<16x128xf32>
    %10 = math.log1p %9 : vector<16x128xf32>
    %11 = arith.addf %5, %10 : vector<16x128xf32>
    %cst_5 = arith.constant 1.000000e+00 : f32
    %12 = vector.broadcast %cst_5 : f32 to vector<16x128xf32>
    %13 = arith.mulf %12, %1 : vector<16x128xf32>
    %cst_6 = arith.constant 1.000000e+00 : f32
    %14 = vector.broadcast %cst_6 : f32 to vector<16x128xf32>
    %15 = arith.addf %14, %13 : vector<16x128xf32>
    %16 = arith.mulf %0, %1 : vector<16x128xf32>
    %17 = arith.subf %0, %16 : vector<16x128xf32>
    %18 = arith.mulf %11, %15 : vector<16x128xf32>
    %19 = arith.addf %17, %18 : vector<16x128xf32>
    %20 = vector.shape_cast %19 : vector<16x128xf32> to vector<2x8x128xf32>
    %cst_7 = arith.constant dense<0.000000e+00> : vector<8x128xf32>
    %21 = vector.multi_reduction <add>, %20, %cst_7 [0] : vector<2x8x128xf32> to vector<8x128xf32>
    %c0_8 = arith.constant 0 : index
    %c0_9 = arith.constant 0 : index
    %c0_10 = arith.constant 0 : index
    %22 = vector.load %arg3[%c0_8, %c0_9, %c0_10] : memref<1x8x128xf32, #tpu.memory_space<vmem>>, vector<1x8x128xf32>
    %23 = vector.shape_cast %22 : vector<1x8x128xf32> to vector<8x128xf32>
    %24 = vector.shape_cast %21 : vector<8x128xf32> to vector<1x8x128xf32>
    tpu.vector_store %arg3[%c0_8, %c0_9, %c0_10], %24 {strides = array<i32>} : memref<1x8x128xf32, #tpu.memory_space<vmem>>, vector<1x8x128xf32>,
    return
  }
  func.func @transform_0(%arg0: i32) -> (i32, i32) {
    %c0_i32 = arith.constant 0 : i32
    %c0_i32_0 = arith.constant 0 : i32
    return %arg0, %c0_i32 : i32, i32
  }
  func.func @transform_1(%arg0: i32) -> (i32, i32) {
    %c0_i32 = arith.constant 0 : i32
    %c0_i32_0 = arith.constant 0 : i32
    return %arg0, %c0_i32 : i32, i32
  }
  func.func @transform_2(%arg0: i32) -> (i32, i32, i32) {
    %c0_i32 = arith.constant 0 : i32
    %c0_i32_0 = arith.constant 0 : i32
    %c0_i32_1 = arith.constant 0 : i32
    return %arg0, %c0_i32, %c0_i32_0 : i32, i32, i32
  }
}

</mosaic_0001>

<bundles_post_ra>
// kernel: tpu_custom_call.1
= control target key start
LH: loop header
LB: loop body
LE: loop exit
PB: predicated region body
PF: predicated region fallthrough
CT: control target
= control target key end

     0   :  { %7 = vsyncpa [#allocation3], 0  ;;  %s212_s0 = inlined_call_operand.hbm [shape: f32[16,128], index: 0, kind: input, shape index: {}]   ;;  %s213_s1 = inlined_call_operand.hbm [shape: f32[16,128], index: 1, kind: input, shape index: {}]   ;;  %s214_s2 = inlined_call_operand.hbm [shape: f32[1,8,128], index: 2, kind: output, shape index: {}]  }
   0x1   :  { %8 = vsyncpa [#allocation6], 0 }
   0x2   :  { %9 = vsyncpa [#allocation4], 0  ;;  %s183_s9 = smov [#allocation2]  }
   0x3   :  { %s15_s10 = sshll.u32 %s183_s9, 4  ;;  %s16_s10 = int_to_ptr.vmem [resolvable:$true] %s15_s10 }
   0x4   :  { %s125_s11 = scalar_lea.vmem %s16_s10, 256  ;;  %p130_p1 = scmp.lt.s32.totalorder %s16_s10, %s16_s10 }
   0x5   :  { %p126_p0 = scmp.ne.s32.totalorder %s16_s10, %s125_s11  ;;  %p131_p2 = scmp.lt.s32.totalorder %s125_s11, %s125_s11 }
   0x7   :  { %p132_p3 = por %p131_p2, %p130_p1 }
   0x9   :  { %p133_p4 = pnand %p132_p3, %p126_p0 }
   0xb   :  { %136 = shalt.err (!%p133_p4)
}
   0xc   :  { %s184_s12 = smov 128   ;;  %s185_s13 = smov 8  }
   0xd   :  { %21 = dma.hbm_to_vmem [thread:$0]  %s212_s0, 256, %s16_s10, [#allocation3], %s184_s12, %s184_s12, %s185_s13  }
   0xe   :  { %s186_s16 = smov [#allocation5]  }
   0xf   :  { %s27_s17 = sshll.u32 %s186_s16, 4  ;;  %s28_s17 = int_to_ptr.vmem [resolvable:$true] %s27_s17 }
  0x10   :  { %s145_s18 = scalar_lea.vmem %s28_s17, 256  ;;  %p150_p6 = scmp.lt.s32.totalorder %s28_s17, %s28_s17 }
  0x11   :  { %p146_p5 = scmp.ne.s32.totalorder %s28_s17, %s145_s18  ;;  %p151_p7 = scmp.lt.s32.totalorder %s145_s18, %s145_s18 }
  0x13   :  { %p152_p8 = por %p151_p7, %p150_p6 }
  0x15   :  { %p153_p9 = pnand %p152_p8, %p146_p5 }
  0x17   :  { %156 = shalt.err (!%p153_p9)
}
  0x18   :  { %33 = dma.hbm_to_vmem [thread:$0]  %s213_s1, 256, %s28_s17, [#allocation6], %s184_s12, %s184_s12, %s185_s13  }
  0x19   :  { %177 = dma.done.wait [#allocation3], 256  }
  0x1a   :  { %178 = vsyncadd [#allocation3], 4294967040 }
  0x1b   :  { %179 = dma.done.wait [#allocation6], 256  }
  0x1c   :  { %180 = vsyncadd [#allocation6], 4294967040  ;;  %v40_v0 = vld [vmem:[#allocation2] sm:$0xff]  ;;  %v41_v1 = vld [vmem:[#allocation2 + $0x8] sm:$0xff]  ;;  %s187_s0 = smov [#allocation7]  }
  0x1d   :  { %v48_v2 = vand.u32 2147483647, %v40_v0  ;;  %v49_v3 = vand.u32 2147483647, %v41_v1  ;;  %v44_v15 = vsub.f32 0.0, %v40_v0  ;;  %v42_v18 = vld [vmem:[#allocation5] sm:$0xff] }
  0x1e   :  { %v45_v19 = vsub.f32 0.0, %v41_v1  ;;  %v43_v21 = vld [vmem:[#allocation5 + $0x8] sm:$0xff]  ;;  %v78_v26 = vmul.f32 %v42_v18, %v40_v0  ;;  %v76_v32 = vadd.f32 1.0, %v42_v18  ;;  %s94_s1 = sshll.u32 %s187_s0, 4  ;;  %s95_s1 = int_to_ptr.vmem [resolvable:$true] %s94_s1 }
  0x1f   :  { %v50_v4 = vsub.f32 0.0, %v48_v2  ;;  %v51_v5 = vsub.f32 0.0, %v49_v3  ;;  %v46_v24 = vmax.f32 %v44_v15, 0.0  ;;  %v79_v30 = vmul.f32 %v43_v21, %v41_v1  ;;  %s157_s21 = scalar_lea.vmem %s95_s1, 128  ;;  %p162_p11 = scmp.lt.s32.totalorder %s95_s1, %s95_s1 }
  0x20   :  { %v47_v28 = vmax.f32 %v45_v19, 0.0  ;;  %v77_v34 = vadd.f32 1.0, %v43_v21  ;;  %v80_v37 = vsub.f32 %v40_v0, %v78_v26  ;;  %p158_p10 = scmp.ne.s32.totalorder %s95_s1, %s157_s21  ;;  %p163_p12 = scmp.lt.s32.totalorder %s157_s21, %s157_s21 }
  0x21   :  { %v52_v6 = vmul.f32 1.442695, %v50_v4  ;;  %v54_v7 = vmul.f32 1.442695, %v51_v5  ;;  %v81_v39 = vsub.f32 %v41_v1, %v79_v30 }
  0x22   :  { %p164_p13 = por %p163_p12, %p162_p11 }
  0x23   :  { %109 = vpow2.f32 %v52_v6 }
  0x24   :  { %111 = vpow2.f32 %v54_v7  ;;  %p165_p0 = pnand %p164_p13, %p158_p10 }
  0x30   :  { %v110_v8 = vpop.eup %109 }
  0x31   :  { %v112_v9 = vpop.eup %111  ;;  %v56_v10 = vadd.f32 1.0, %v110_v8  ;;  %v59_v12 = vmul.f32 -0.5, %v110_v8  ;;  %v62_v16 = vand.u32 2147483647, %v110_v8 }
  0x32   :  { %v65_v11 = vadd.f32 1.0, %v112_v9  ;;  %v68_v13 = vmul.f32 -0.5, %v112_v9  ;;  %v71_v20 = vand.u32 2147483647, %v112_v9 }
  0x33   :  { %113 = vlog2.f32 %v56_v10  ;;  %v60_v14 = vadd.f32 1.0, %v59_v12  ;;  %vm63_vm0 = vcmp.lt.f32.partialorder %v62_v16, 0.0004427343 }
  0x34   :  { %115 = vlog2.f32 %v65_v11  ;;  %v69_v17 = vadd.f32 1.0, %v68_v13  ;;  %vm72_vm1 = vcmp.lt.f32.partialorder %v71_v20, 0.0004427343 }
  0x35   :  { %v61_v22 = vmul.f32 %v110_v8, %v60_v14 }
  0x36   :  { %v70_v25 = vmul.f32 %v112_v9, %v69_v17 }
  0x40   :  { %v114_v23 = vpop.eup %113 }
  0x41   :  { %v116_v27 = vpop.eup %115  ;;  %v58_v29 = vmul.f32 0.6931472, %v114_v23 }
  0x42   :  { %v67_v31 = vmul.f32 0.6931472, %v116_v27 }
  0x43   :  { %v64_v33 = vsel %vm63_vm0, %v61_v22, %v58_v29 }
  0x44   :  { %v73_v35 = vsel %vm72_vm1, %v70_v25, %v67_v31  ;;  %v74_v36 = vadd.f32 %v64_v33, %v46_v24 }
  0x45   :  { %v75_v38 = vadd.f32 %v73_v35, %v47_v28 }
  0x46   :  { %v82_v40 = vmul.f32 %v76_v32, %v74_v36 }
  0x47   :  { %v83_v41 = vmul.f32 %v77_v34, %v75_v38 }
  0x48   :  { %v84_v42 = vadd.f32 %v82_v40, %v80_v37 }
  0x49   :  { %v85_v43 = vadd.f32 %v83_v41, %v81_v39 }
  0x4b   :  { %v86_v44 = vadd.f32 %v85_v43, %v84_v42 }
  0x4d   :  { %87 = vst [vmem:[#allocation7] sm:$0xff] %v86_v44 }
  0x4e   :  { %168 = shalt.err (!%p165_p0)
}
  0x4f   :  { %97 = dma.vmem_to_hbm [thread:$0]  %s95_s1, 128, %s214_s2, [#allocation4]  }
  0x50   :  { %181 = dma.done.wait [#allocation4], 128  }
  0x51   :  { %182 = vsyncadd [#allocation4], 4294967168 }
  0x52   :  { %101 = vsyncpa [#allocation3], 1 }
  0x53   :  { %102 = vsyncpa [#allocation6], 1 }
  0x54   :  { %103 = vsyncpa [#allocation4], 1 }

</bundles_post_ra>
